<compile_context>
chip_gen: v7x
topology: tpu7x:2x2x1
jax: 0.10.0
libtpu: 0.0.40
codegen_flags: <defaults>
</compile_context>

<pallas_src>
import functools

import jax
import jax.numpy as jnp
from jax import lax
from jax.experimental import pallas as pl
from jax.experimental.pallas import tpu as pltpu

LANE = 128


def _round_up(x, m):
    return (x + m - 1) // m * m


# ---------------------------------------------------------------------------
# Pallas kernel: conv-as-matmul -> bias -> ReLU -> sublane-sum pool ->
# concat-by-add into one 128-lane feature row -> single bf16 classifier
# matmul -> lane-dense logits store.
# ---------------------------------------------------------------------------
def multi_image_kernel(patches_ref,   # (HW, KKC)       bf16 im2col patches
                       wc_ref,        # (KKC, COUT_P)   bf16 conv weight
                       bc_ref,        # (1, COUT_P)     f32 conv bias
                       x2_ref,        # (1, COUT_P)     f32, x2 at lanes [cout, cout+d2)
                       wcat_ref,      # (COUT_P, NC_P)  bf16 fused clf weight (1/HW folded)
                       bclf_ref,      # (1, NC_P)       f32 clf bias
                       out_ref):      # (1, NC_P)       f32 logits (padded)
    # fe: Conv2d via a single im2col matmul (bf16 in, f32 acc) + bias + ReLU.
    conv = jnp.dot(patches_ref[...], wc_ref[...],
                   preferred_element_type=jnp.float32)
    conv = jnp.maximum(conv + bc_ref[...], 0.0)               # (HW, COUT_P) f32

    # AdaptiveAvgPool2d((1,1)) + Flatten: plain sublane SUM on the VPU/XLU.
    # The 1/HW mean scale was folded into wcat's pooled rows at init, so no
    # MXU pool matmul and no extra pool operand are needed.
    pooled = jnp.sum(conv, axis=0, keepdims=True)             # (1, COUT_P) f32

    # torch.cat((f, x2), dim=1): padded conv lanes [cout:] pool to exactly 0
    # and x2 arrives pre-placed in lanes [cout, cout+d2), so the concat is a
    # single vreg add -- no VMEM scratch round trip.
    feat = pooled + x2_ref[...]                               # (1, COUT_P) f32

    # clf: ONE bf16 matmul over the compact 128-lane feature row (K = 128).
    out_ref[...] = (jnp.dot(feat.astype(jnp.bfloat16), wcat_ref[...],
                            preferred_element_type=jnp.float32)
                    + bclf_ref[...])


# ---------------------------------------------------------------------------
# One-time parameter layout (hoisted out of the per-call path).
# ---------------------------------------------------------------------------
def init_multi_image(conv_w, conv_b, clf_w, clf_b, *, h, w):
    cout, cin, kh, kw = conv_w.shape
    num_classes, in_feat = clf_w.shape
    d2 = in_feat - cout
    hw = h * w

    assert kh % 2 == 1 and kw % 2 == 1, (
        "'same' im2col path assumes odd kernel sizes (stride 1)")

    cout_p = _round_up(cout, LANE)
    nc_p = _round_up(num_classes, LANE)
    assert cout + d2 <= cout_p, (
        "compact feature row needs Cout + len(x2) <= 128; grow to a second "
        "128-lane block if this model ever exceeds it")

    # conv weight (Cout, Cin, Kh, Kw) -> im2col layout (Kh*Kw*Cin, Cout),
    # zero-padded to 128 lanes on N only (K deliberately left unpadded),
    # bf16 for the MXU.
    wc = jnp.transpose(conv_w, (2, 3, 1, 0)).reshape(kh * kw * cin, cout)
    wc = jnp.pad(wc.astype(jnp.float32),
                 ((0, 0), (0, cout_p - cout))).astype(jnp.bfloat16)
    bc = jnp.pad(conv_b.reshape(1, cout).astype(jnp.float32),
                 ((0, 0), (0, cout_p - cout)))

    # clf weight (NC, Cout + D2) -> ONE compact (COUT_P, NC_P) bf16 matrix:
    #   rows [0, cout)       : pooled-feature weights, pre-scaled by 1/HW
    #                          (so the kernel pools with a plain sum)
    #   rows [cout, cout+d2) : x2 weights (matches x2's in-row lane placement)
    wcat = jnp.zeros((cout_p, nc_p), jnp.float32)
    wcat = wcat.at[:cout, :num_classes].set(
        jnp.transpose(clf_w[:, :cout]).astype(jnp.float32) / float(hw))
    wcat = wcat.at[cout:cout + d2, :num_classes].set(
        jnp.transpose(clf_w[:, cout:]).astype(jnp.float32))
    wcat = wcat.astype(jnp.bfloat16)

    bclf = jnp.pad(clf_b.reshape(1, num_classes).astype(jnp.float32),
                   ((0, 0), (0, nc_p - num_classes)))

    params = dict(wc=wc, bc=bc, wcat=wcat, bclf=bclf)
    meta = dict(kh=kh, kw=kw, cout=cout, num_classes=num_classes)
    return params, meta


def _im2col_nhwc(x_nhwc, kh, kw):
    """Stride-1 'same' patches (odd kernels only). Returns (N*H*W, kh*kw*Cin)
    with (kh outer, kw, cin inner) ordering; pads H by kh//2, W by kw//2."""
    n, h, w, c = x_nhwc.shape
    assert kh % 2 == 1 and kw % 2 == 1, "'same' padding assumes odd kernels"
    ph, pw = kh // 2, kw // 2
    xp = jnp.pad(x_nhwc, ((0, 0), (ph, ph), (pw, pw), (0, 0)))
    cols = []
    for i in range(kh):
        for j in range(kw):
            cols.append(xp[:, i:i + h, j:j + w, :])              # (N, H, W, Cin)
    patches = jnp.concatenate(cols, axis=-1)                     # (N, H, W, KKC)
    return patches.reshape(n * h * w, kh * kw * c)


# ---------------------------------------------------------------------------
# Per-call forward (activation plumbing only + the fused Pallas kernel).
# ---------------------------------------------------------------------------
@functools.partial(jax.jit, static_argnames=("kh", "kw", "cout", "num_classes"))
def multi_image_forward(x1_nchw, x2_vec, wc, bc, wcat, bclf,
                        *, kh, kw, cout, num_classes):
    n, cin, h, w = x1_nchw.shape
    assert n == 1, "MultiImage.forward implies batch 1 (x2 is unsqueeze(0))"
    hw = h * w
    kkc = wc.shape[0]
    cout_p = wc.shape[1]
    nc_p = wcat.shape[1]
    d2 = x2_vec.shape[0]

    # Activation-side glue only (weights laid out once at init).  The
    # transpose + im2col + bf16 cast fuse into one XLA fusion; x2 costs one
    # tiny pad that places it directly at its classifier lanes [cout, cout+d2).
    x1_nhwc = jnp.transpose(x1_nchw, (0, 2, 3, 1)).astype(jnp.float32)
    patches = _im2col_nhwc(x1_nhwc, kh, kw).astype(jnp.bfloat16)   # (HW, KKC)
    x2 = jnp.pad(x2_vec.reshape(1, d2).astype(jnp.float32),
                 ((0, 0), (cout, cout_p - cout - d2)))             # (1, COUT_P)

    cost = pl.CostEstimate(
        flops=2 * hw * kkc * cout_p            # conv matmul
              + hw * cout_p                    # pooled sum
              + 2 * cout_p * nc_p,             # classifier matmul
        transcendentals=0,
        bytes_accessed=(patches.size * 2 + wc.size * 2 + wcat.size * 2
                        + (bc.size + x2.size + bclf.size + nc_p) * 4))

    vmem = pl.BlockSpec(memory_space=pltpu.MemorySpace.VMEM)
    out_padded = pl.pallas_call(
        multi_image_kernel,
        out_shape=jax.ShapeDtypeStruct((1, nc_p), jnp.float32),
        in_specs=[vmem] * 6,
        out_specs=vmem,
        cost_estimate=cost,
    )(patches, wc, bc, x2, wcat, bclf)

    # Kernel stores a lane-dense (1, NC_P) row; expose only the real logits.
    return out_padded[:, :num_classes]


# ---------------------------------------------------------------------------
# Plain-JAX reference (mirrors the PyTorch graph) for validation.
# ---------------------------------------------------------------------------
def reference_forward(x1_nchw, x2_vec, conv_w, conv_b, clf_w, clf_b):
    kh, kw = conv_w.shape[2], conv_w.shape[3]
    f1 = lax.conv_general_dilated(
        x1_nchw.astype(jnp.float32), conv_w.astype(jnp.float32),
        window_strides=(1, 1),
        padding=((kh // 2, kh // 2), (kw // 2, kw // 2)),
        dimension_numbers=("NCHW", "OIHW", "NCHW"))
    f1 = f1 + conv_b.reshape(1, -1, 1, 1)
    f1 = jnp.maximum(f1, 0.0)                                    # fe = Conv + ReLU
    f = jnp.mean(f1, axis=(2, 3))                                # avg_pool + flatten
    x2 = x2_vec.reshape(1, -1).astype(jnp.float32)
    f = jnp.concatenate((f, x2), axis=1)                         # torch.cat dim=1
    return f @ clf_w.T + clf_b                                   # clf = Linear


if __name__ == "__main__":
    # Small deterministic shapes consistent with the module's forward
    # (batch must be 1: x2 is unsqueezed to batch 1 before the concat).
    N, Cin, H, W = 1, 4, 16, 16
    Cout, K = 32, 3
    D2 = 8               # length of the auxiliary x2 vector
    NUM_CLASSES = 8

    key = jax.random.PRNGKey(0)
    k_x1, k_x2, k_cw, k_cb, k_lw, k_lb = jax.random.split(key, 6)

    x1 = jax.random.normal(k_x1, (N, Cin, H, W), dtype=jnp.float32)
    x2 = jax.random.normal(k_x2, (D2,), dtype=jnp.float32)       # the "numpy" input

    # fe = Conv2d(Cin, Cout, 3, padding=1) + ReLU ; clf = Linear(Cout+D2, NC)
    conv_w = 0.1 * jax.random.normal(k_cw, (Cout, Cin, K, K), dtype=jnp.float32)
    conv_b = 0.1 * jax.random.normal(k_cb, (Cout,), dtype=jnp.float32)
    clf_w = 0.1 * jax.random.normal(k_lw, (NUM_CLASSES, Cout + D2), dtype=jnp.float32)
    clf_b = 0.1 * jax.random.normal(k_lb, (NUM_CLASSES,), dtype=jnp.float32)

    # One-time layout plumbing (hoisted out of the per-call path).
    params, meta = init_multi_image(conv_w, conv_b, clf_w, clf_b, h=H, w=W)

    out = multi_image_forward(
        x1, x2, params["wc"], params["bc"], params["wcat"], params["bclf"],
        kh=meta["kh"], kw=meta["kw"], cout=meta["cout"],
        num_classes=meta["num_classes"])
    out = jax.block_until_ready(out)

    ref = jax.block_until_ready(
        reference_forward(x1, x2, conv_w, conv_b, clf_w, clf_b))

    assert out.shape == (1, NUM_CLASSES)
    # bf16 conv + bf16 classifier operands with f32 accumulation.
    assert jnp.allclose(out, ref, rtol=2e-2, atol=2e-2), (out, ref)
    print("KERNEL_OK")
</pallas_src>

<mosaic_0001>
module attributes {stable_mosaic.version = 11 : i64} {
  func.func @multi_image_kernel(%arg0: memref<256x36xbf16, #tpu.memory_space<vmem>>, %arg1: memref<36x128xbf16, #tpu.memory_space<vmem>>, %arg2: memref<1x128xf32, #tpu.memory_space<vmem>>, %arg3: memref<1x128xf32, #tpu.memory_space<vmem>>, %arg4: memref<128x128xbf16, #tpu.memory_space<vmem>>, %arg5: memref<1x128xf32, #tpu.memory_space<vmem>>, %arg6: memref<1x128xf32, #tpu.memory_space<vmem>>) attributes {dimension_semantics = [], scalar_prefetch = 0 : i64, scratch_operands = 0 : i64, tpu.core_type = #tpu.core_type<tc>} {
    %c0 = arith.constant 0 : index
    %c0_0 = arith.constant 0 : index
    %0 = vector.load %arg0[%c0, %c0_0] : memref<256x36xbf16, #tpu.memory_space<vmem>>, vector<256x36xbf16>
    %c0_1 = arith.constant 0 : index
    %c0_2 = arith.constant 0 : index
    %1 = vector.load %arg1[%c0_1, %c0_2] : memref<36x128xbf16, #tpu.memory_space<vmem>>, vector<36x128xbf16>
    %cst = arith.constant dense<0.000000e+00> : vector<256x128xf32>
    %2 = tpu.matmul %0, %1, %cst {dimension_numbers = #tpu.dot_dimension_numbers<[1], [0], [0], [1], [0, 0, 1, 1], [], []>} : vector<256x36xbf16>, vector<36x128xbf16>, vector<256x128xf32> -> vector<256x128xf32>
    %c0_3 = arith.constant 0 : index
    %c0_4 = arith.constant 0 : index
    %3 = vector.load %arg2[%c0_3, %c0_4] : memref<1x128xf32, #tpu.memory_space<vmem>>, vector<1x128xf32>
    %4 = vector.broadcast %3 : vector<1x128xf32> to vector<256x128xf32>
    %5 = arith.addf %2, %4 : vector<256x128xf32>
    %cst_5 = arith.constant 0.000000e+00 : f32
    %6 = vector.broadcast %cst_5 : f32 to vector<256x128xf32>
    %7 = arith.maximumf %5, %6 : vector<256x128xf32>
    %cst_6 = arith.constant dense<0.000000e+00> : vector<128xf32>
    %8 = vector.multi_reduction <add>, %7, %cst_6 [0] : vector<256x128xf32> to vector<128xf32>
    %9 = vector.shape_cast %8 : vector<128xf32> to vector<1x128xf32>
    %c0_7 = arith.constant 0 : index
    %c0_8 = arith.constant 0 : index
    %10 = vector.load %arg3[%c0_7, %c0_8] : memref<1x128xf32, #tpu.memory_space<vmem>>, vector<1x128xf32>
    %11 = arith.addf %9, %10 : vector<1x128xf32>
    %12 = arith.truncf %11 : vector<1x128xf32> to vector<1x128xbf16>
    %c0_9 = arith.constant 0 : index
    %c0_10 = arith.constant 0 : index
    %13 = vector.load %arg4[%c0_9, %c0_10] : memref<128x128xbf16, #tpu.memory_space<vmem>>, vector<128x128xbf16>
    %cst_11 = arith.constant dense<0.000000e+00> : vector<1x128xf32>
    %14 = tpu.matmul %12, %13, %cst_11 {dimension_numbers = #tpu.dot_dimension_numbers<[1], [0], [0], [1], [0, 0, 1, 1], [], []>} : vector<1x128xbf16>, vector<128x128xbf16>, vector<1x128xf32> -> vector<1x128xf32>
    %c0_12 = arith.constant 0 : index
    %c0_13 = arith.constant 0 : index
    %15 = vector.load %arg5[%c0_12, %c0_13] : memref<1x128xf32, #tpu.memory_space<vmem>>, vector<1x128xf32>
    %16 = arith.addf %14, %15 : vector<1x128xf32>
    %c0_14 = arith.constant 0 : index
    %c0_15 = arith.constant 0 : index
    %17 = vector.load %arg6[%c0_14, %c0_15] : memref<1x128xf32, #tpu.memory_space<vmem>>, vector<1x128xf32>
    tpu.vector_store %arg6[%c0_14, %c0_15], %16 {strides = array<i32>} : memref<1x128xf32, #tpu.memory_space<vmem>>, vector<1x128xf32>,
    return
  }
}

</mosaic_0001>

<bundles_post_ra>
// kernel: multi_image_forward.1
= control target key start
LH: loop header
LB: loop body
LE: loop exit
PB: predicated region body
PF: predicated region fallthrough
CT: control target
= control target key end

     0   :  { %vm164_vm0 = vcmask 293888   ;;  %vm213_vm1 = vcmask 1041408   ;;  %s945_s0 = inlined_call_operand.vmem [shape: bf16[256,36], index: 0, kind: input, shape index: {}]   ;;  %s946_s1 = inlined_call_operand.vmem [shape: bf16[36,128], index: 1, kind: input, shape index: {}]   ;;  %s947_s2 = inlined_call_operand.vmem [shape: f32[1,128], index: 2, kind: input, shape index: {}]   ;;  %s948_s3 = inlined_call_operand.vmem [shape: f32[1,128], index: 3, kind: input, shape index: {}]   ;;  %s949_s4 = inlined_call_operand.vmem [shape: bf16[128,128], index: 4, kind: input, shape index: {}]   ;;  %s950_s5 = inlined_call_operand.vmem [shape: f32[1,128], index: 5, kind: input, shape index: {}]   ;;  %s951_s6 = inlined_call_operand.hbm [shape: f32[1,128], index: 6, kind: output, shape index: {}]  }
   0x1   :  { %v704_v0 = vld [vmem:[%s946_s1] sm:$0xff]   ;;  %v705_v1 = vld [vmem:[%s946_s1 + $0x8] sm:$0xff]   ;;  %v706_v2 = vld [vmem:[%s946_s1 + $0x10] ss:$0 sps:$4 sm:$0x33]  }
   0x2   :  { %642 = vmatprep.subr.bf16.mxu0 %v704_v0  ;;  %v707_v3 = vld [vmem:[%s945_s0] sm:$0xff]   ;;  %v215_v4 = vsel %vm213_vm1, %v706_v2, 0  ;;  %v708_v5 = vld [vmem:[%s945_s0 + $0x8] sm:$0xff]   ;;  %v709_v6 = vld [vmem:[%s945_s0 + $0x10] sm:$0xff]  }
   0x3   :  { %643 = vmatpush3.bf16.msra.mxu0 %v704_v0  ;;  %648 = vmatprep.mubr.msk.bf16.mxu0 %vm164_vm0, %v707_v3  ;;  %v710_v7 = vld [vmem:[%s945_s0 + $0x18] sm:$0xff]   ;;  %v711_v8 = vld [vmem:[%s945_s0 + $0x20] sm:$0xff]  }
   0x4   :  { %644 = vmatprep.subr.bf16.mxu0 %v705_v1 }
   0x7   :  { %645 = vmatpush3.bf16.msra.mxu0 %v705_v1 }
   0x8   :  { %700 = vmatprep.subr.msk.bf16.mxu0 %vm213_vm1, %v706_v2 }
   0xb   :  { %647 = vmatpush3.bf16.msra.mxu0 %v215_v4 }
   0xe   :  { %649 = vmatmul.mubr.msk.bf16.vlgmr.msra.gmra.mrb[0].mxu0 %vm164_vm0, %v708_v5 }
   0xf   :  { %652 = vmatprep.mubr.msk.bf16.mxu0 %vm164_vm0, %v709_v6 }
  0x16   :  { %653 = vmatmul.mubr.msk.bf16.gmra.mrb[4].mxu0 %vm164_vm0, %v710_v7 }
  0x17   :  { %656 = vmatprep.mubr.msk.bf16.mxu0 %vm164_vm0, %v711_v8 }
  0x18   :  { %11 = vsyncpa [#allocation3], 0  ;;  %v712_v9 = vld [vmem:[%s945_s0 + $0x28] sm:$0xff]   ;;  %v713_v10 = vld [vmem:[%s945_s0 + $0x30] sm:$0xff]   ;;  %v755_v21 = vmov 0.0   ;;  %vm756_vm2 = vmmov 0  }
  0x19   :  { %v714_v11 = vld [vmem:[%s945_s0 + $0x38] sm:$0xff]   ;;  %v715_v12 = vld [vmem:[%s945_s0 + $0x40] sm:$0xff]   ;;  %v716_v13 = vld [vmem:[%s945_s0 + $0x48] sm:$0xff]   ;;  %680 = vmatprep.subr.bf16.mxu1 %v755_v21  ;;  %696 = vmatprep.mubr.msk.bf16.mxu1 %vm756_vm2, %v755_v21  ;;  %s757_s28 = smov [#allocation2]  }
  0x1a   :  { %v717_v14 = vld [vmem:[%s945_s0 + $0x50] sm:$0xff]   ;;  %v718_v15 = vld [vmem:[%s945_s0 + $0x58] sm:$0xff]   ;;  %v719_v16 = vld [vmem:[%s945_s0 + $0x60] sm:$0xff]   ;;  %s562_s29 = sshll.u32 %s757_s28, 4  ;;  %s563_s29 = int_to_ptr.vmem [resolvable:$true] %s562_s29 }
  0x1b   :  { %v720_v17 = vld [vmem:[%s945_s0 + $0x68] sm:$0xff]   ;;  %v721_v18 = vld [vmem:[%s945_s0 + $0x70] sm:$0xff]   ;;  %v722_v19 = vld [vmem:[%s945_s0 + $0x78] sm:$0xff]   ;;  %s731_s30 = scalar_lea.vmem %s563_s29, 16  ;;  %p736_p1 = scmp.lt.s32.totalorder %s563_s29, %s563_s29 }
  0x1c   :  { %v723_v20 = vld [vmem:[%s949_s4] sm:$0xff]   ;;  %v724_v22 = vld [vmem:[%s949_s4 + $0x8] sm:$0xff]   ;;  %v725_v23 = vld [vmem:[%s949_s4 + $0x10] sm:$0xff]   ;;  %p732_p0 = scmp.ne.s32.totalorder %s563_s29, %s731_s30 }
  0x1d   :  { %681 = vmatpush3.bf16.msra.mxu1 %v723_v20  ;;  %v726_v24 = vld [vmem:[%s949_s4 + $0x18] sm:$0xff]   ;;  %v727_v25 = vld [vmem:[%s949_s4 + $0x20] sm:$0xff]   ;;  %v728_v26 = vld [vmem:[%s949_s4 + $0x28] sm:$0xff]  }
  0x1e   :  { %657 = vmatmul.mubr.msk.bf16.gmra.mrb[8].mxu0 %vm164_vm0, %v712_v9  ;;  %682 = vmatprep.subr.bf16.mxu1 %v755_v21  ;;  %v729_v27 = vld [vmem:[%s949_s4 + $0x30] sm:$0xff]   ;;  %v730_v28 = vld [vmem:[%s949_s4 + $0x38] sm:$0xff]   ;;  %v893_v29 = vld [vmem:[%s947_s2] ss:$0 sm:$0xff] }
  0x1f   :  { %660 = vmatprep.mubr.msk.bf16.mxu0 %vm164_vm0, %v713_v10 }
  0x21   :  { %683 = vmatpush3.bf16.msra.mxu1 %v724_v22 }
  0x22   :  { %684 = vmatprep.subr.bf16.mxu1 %v755_v21 }
  0x25   :  { %685 = vmatpush3.bf16.msra.mxu1 %v725_v23 }
  0x26   :  { %661 = vmatmul.mubr.msk.bf16.gmra.mrb[12].mxu0 %vm164_vm0, %v714_v11  ;;  %686 = vmatprep.subr.bf16.mxu1 %v755_v21 }
  0x27   :  { %664 = vmatprep.mubr.msk.bf16.mxu0 %vm164_vm0, %v715_v12 }
  0x29   :  { %687 = vmatpush3.bf16.msra.mxu1 %v726_v24 }
  0x2a   :  { %688 = vmatprep.subr.bf16.mxu1 %v755_v21 }
  0x2d   :  { %689 = vmatpush3.bf16.msra.mxu1 %v727_v25 }
  0x2e   :  { %665 = vmatmul.mubr.msk.bf16.gmra.mrb[16].mxu0 %vm164_vm0, %v716_v13  ;;  %690 = vmatprep.subr.bf16.mxu1 %v755_v21 }
  0x2f   :  { %668 = vmatprep.mubr.msk.bf16.mxu0 %vm164_vm0, %v717_v14 }
  0x31   :  { %691 = vmatpush3.bf16.msra.mxu1 %v728_v26 }
  0x32   :  { %692 = vmatprep.subr.bf16.mxu1 %v755_v21 }
  0x35   :  { %693 = vmatpush3.bf16.msra.mxu1 %v729_v27 }
  0x36   :  { %669 = vmatmul.mubr.msk.bf16.gmra.mrb[20].mxu0 %vm164_vm0, %v718_v15  ;;  %694 = vmatprep.subr.bf16.mxu1 %v755_v21 }
  0x37   :  { %672 = vmatprep.mubr.msk.bf16.mxu0 %vm164_vm0, %v719_v16 }
  0x39   :  { %695 = vmatpush3.bf16.msra.mxu1 %v730_v28 }
  0x3e   :  { %673 = vmatmul.mubr.msk.bf16.gmra.mrb[24].mxu0 %vm164_vm0, %v720_v17 }
  0x3f   :  { %676 = vmatprep.mubr.msk.bf16.mxu0 %vm164_vm0, %v721_v18 }
  0x46   :  { %677 = vmatmul.mubr.msk.bf16.gmra.mrb[28].mxu0 %vm164_vm0, %v722_v19 }
  0xe1   :  { %v650_v30 = vpop.f32.mrb[0].mxu0 }
  0xe2   :  { %v251_v31 = vpop.f32.mrb[1].mxu0  ;;  %v260_v35 = vadd.f32 %v650_v30, %v893_v29 }
  0xe3   :  { %v252_v32 = vadd.f32 %v893_v29, %v251_v31  ;;  %v651_v33 = vpop.f32.mrb[2].mxu0 }
  0xe4   :  { %v254_v34 = vpop.f32.mrb[3].mxu0  ;;  %v263_v38 = vadd.f32 %v651_v33, %v893_v29  ;;  %v380_v40 = vmax.f32 %v260_v35, 0.0 }
  0xe5   :  { %v255_v36 = vadd.f32 %v893_v29, %v254_v34  ;;  %v378_v37 = vmax.f32 %v252_v32, 0.0 }
  0xe6   :  { %v381_v44 = vmax.f32 %v263_v38, 0.0 }
  0xe7   :  { %v379_v39 = vmax.f32 %v255_v36, 0.0 }
  0xe9   :  { %v410_v41 = vadd.f32 %v379_v39, %v378_v37  ;;  %v654_v42 = vpop.f32.mrb[4].mxu0 }
  0xea   :  { %v267_v43 = vpop.f32.mrb[5].mxu0  ;;  %v276_v49 = vadd.f32 %v654_v42, %v893_v29 }
  0xeb   :  { %v411_v45 = vadd.f32 %v410_v41, %v380_v40  ;;  %v268_v46 = vadd.f32 %v893_v29, %v267_v43  ;;  %v655_v47 = vpop.f32.mrb[6].mxu0 }
  0xec   :  { %v270_v48 = vpop.f32.mrb[7].mxu0  ;;  %v279_v54 = vadd.f32 %v655_v47, %v893_v29  ;;  %v384_v56 = vmax.f32 %v276_v49, 0.0 }
  0xed   :  { %v382_v50 = vmax.f32 %v268_v46, 0.0  ;;  %v412_v51 = vadd.f32 %v411_v45, %v381_v44  ;;  %v271_v52 = vadd.f32 %v893_v29, %v270_v48 }
  0xee   :  { %v385_v60 = vmax.f32 %v279_v54, 0.0 }
  0xef   :  { %v413_v53 = vadd.f32 %v412_v51, %v382_v50  ;;  %v383_v55 = vmax.f32 %v271_v52, 0.0 }
  0xf1   :  { %v414_v57 = vadd.f32 %v413_v53, %v383_v55  ;;  %v658_v58 = vpop.f32.mrb[8].mxu0 }
  0xf2   :  { %v283_v59 = vpop.f32.mrb[9].mxu0  ;;  %v292_v1 = vadd.f32 %v658_v58, %v893_v29 }
  0xf3   :  { %v415_v61 = vadd.f32 %v414_v57, %v384_v56  ;;  %v284_v62 = vadd.f32 %v893_v29, %v283_v59  ;;  %v659_v63 = vpop.f32.mrb[10].mxu0 }
  0xf4   :  { %v286_v0 = vpop.f32.mrb[11].mxu0  ;;  %v295_v6 = vadd.f32 %v659_v63, %v893_v29  ;;  %v388_v8 = vmax.f32 %v292_v1, 0.0 }
  0xf5   :  { %v386_v2 = vmax.f32 %v284_v62, 0.0  ;;  %v416_v3 = vadd.f32 %v415_v61, %v385_v60  ;;  %v287_v4 = vadd.f32 %v893_v29, %v286_v0 }
  0xf6   :  { %v389_v12 = vmax.f32 %v295_v6, 0.0 }
  0xf7   :  { %v417_v5 = vadd.f32 %v416_v3, %v386_v2  ;;  %v387_v7 = vmax.f32 %v287_v4, 0.0 }
  0xf9   :  { %v418_v9 = vadd.f32 %v417_v5, %v387_v7  ;;  %v662_v10 = vpop.f32.mrb[12].mxu0 }
  0xfa   :  { %v299_v11 = vpop.f32.mrb[13].mxu0  ;;  %v308_v17 = vadd.f32 %v662_v10, %v893_v29 }
  0xfb   :  { %v419_v13 = vadd.f32 %v418_v9, %v388_v8  ;;  %v300_v14 = vadd.f32 %v893_v29, %v299_v11  ;;  %v663_v15 = vpop.f32.mrb[14].mxu0 }
  0xfc   :  { %v302_v16 = vpop.f32.mrb[15].mxu0  ;;  %v311_v22 = vadd.f32 %v663_v15, %v893_v29  ;;  %v392_v24 = vmax.f32 %v308_v17, 0.0 }
  0xfd   :  { %v390_v18 = vmax.f32 %v300_v14, 0.0  ;;  %v420_v19 = vadd.f32 %v419_v13, %v389_v12  ;;  %v303_v20 = vadd.f32 %v893_v29, %v302_v16 }
  0xfe   :  { %v393_v28 = vmax.f32 %v311_v22, 0.0 }
  0xff   :  { %v421_v21 = vadd.f32 %v420_v19, %v390_v18  ;;  %v391_v23 = vmax.f32 %v303_v20, 0.0 }
 0x101   :  { %v422_v25 = vadd.f32 %v421_v21, %v391_v23  ;;  %v666_v26 = vpop.f32.mrb[16].mxu0 }
 0x102   :  { %v315_v27 = vpop.f32.mrb[17].mxu0  ;;  %v324_v34 = vadd.f32 %v666_v26, %v893_v29 }
 0x103   :  { %v423_v30 = vadd.f32 %v422_v25, %v392_v24  ;;  %v316_v31 = vadd.f32 %v893_v29, %v315_v27  ;;  %v667_v32 = vpop.f32.mrb[18].mxu0 }
 0x104   :  { %v318_v33 = vpop.f32.mrb[19].mxu0  ;;  %v327_v39 = vadd.f32 %v667_v32, %v893_v29  ;;  %v396_v41 = vmax.f32 %v324_v34, 0.0 }
 0x105   :  { %v394_v35 = vmax.f32 %v316_v31, 0.0  ;;  %v424_v36 = vadd.f32 %v423_v30, %v393_v28  ;;  %v319_v37 = vadd.f32 %v893_v29, %v318_v33 }
 0x106   :  { %v397_v45 = vmax.f32 %v327_v39, 0.0 }
 0x107   :  { %v425_v38 = vadd.f32 %v424_v36, %v394_v35  ;;  %v395_v40 = vmax.f32 %v319_v37, 0.0  ;;  %v447_v36 = vld [vmem:[%s948_s3] sm:$0x1]  ;;  %s735_s3 = scalar_lea.vmem %s563_s29, 32 }
 0x108   :  { %p737_p2 = scmp.lt.s32.totalorder %s735_s3, %s731_s30 }
 0x109   :  { %v426_v42 = vadd.f32 %v425_v38, %v395_v40  ;;  %v670_v43 = vpop.f32.mrb[20].mxu0 }
 0x10a   :  { %v331_v44 = vpop.f32.mrb[21].mxu0  ;;  %v340_v50 = vadd.f32 %v670_v43, %v893_v29  ;;  %p738_p3 = por %p737_p2, %p736_p1 }
 0x10b   :  { %v427_v46 = vadd.f32 %v426_v42, %v396_v41  ;;  %v332_v47 = vadd.f32 %v893_v29, %v331_v44  ;;  %v671_v48 = vpop.f32.mrb[22].mxu0 }
 0x10c   :  { %v334_v49 = vpop.f32.mrb[23].mxu0  ;;  %v343_v55 = vadd.f32 %v671_v48, %v893_v29  ;;  %v400_v57 = vmax.f32 %v340_v50, 0.0  ;;  %p739_p4 = pnand %p738_p3, %p732_p0 }
 0x10d   :  { %v398_v51 = vmax.f32 %v332_v47, 0.0  ;;  %v428_v52 = vadd.f32 %v427_v46, %v397_v45  ;;  %v335_v53 = vadd.f32 %v893_v29, %v334_v49 }
 0x10e   :  { %v401_v61 = vmax.f32 %v343_v55, 0.0 }
 0x10f   :  { %v429_v54 = vadd.f32 %v428_v52, %v398_v51  ;;  %v399_v56 = vmax.f32 %v335_v53, 0.0 }
 0x111   :  { %v430_v58 = vadd.f32 %v429_v54, %v399_v56  ;;  %v674_v59 = vpop.f32.mrb[24].mxu0 }
 0x112   :  { %v347_v60 = vpop.f32.mrb[25].mxu0  ;;  %v356_v2 = vadd.f32 %v674_v59, %v893_v29 }
 0x113   :  { %v431_v62 = vadd.f32 %v430_v58, %v400_v57  ;;  %v348_v63 = vadd.f32 %v893_v29, %v347_v60  ;;  %v675_v0 = vpop.f32.mrb[26].mxu0 }
 0x114   :  { %v350_v1 = vpop.f32.mrb[27].mxu0  ;;  %v359_v7 = vadd.f32 %v675_v0, %v893_v29  ;;  %v404_v9 = vmax.f32 %v356_v2, 0.0 }
 0x115   :  { %v402_v3 = vmax.f32 %v348_v63, 0.0  ;;  %v432_v4 = vadd.f32 %v431_v62, %v401_v61  ;;  %v351_v5 = vadd.f32 %v893_v29, %v350_v1 }
 0x116   :  { %v405_v13 = vmax.f32 %v359_v7, 0.0 }
 0x117   :  { %v433_v6 = vadd.f32 %v432_v4, %v402_v3  ;;  %v403_v8 = vmax.f32 %v351_v5, 0.0 }
 0x119   :  { %v434_v10 = vadd.f32 %v433_v6, %v403_v8  ;;  %v678_v11 = vpop.f32.mrb[28].mxu0 }
 0x11a   :  { %v363_v12 = vpop.f32.mrb[29].mxu0  ;;  %v372_v18 = vadd.f32 %v678_v11, %v893_v29 }
 0x11b   :  { %v435_v14 = vadd.f32 %v434_v10, %v404_v9  ;;  %v364_v15 = vadd.f32 %v893_v29, %v363_v12  ;;  %v679_v16 = vpop.f32.mrb[30].mxu0 }
 0x11c   :  { %v366_v17 = vpop.f32.mrb[31].mxu0  ;;  %v375_v23 = vadd.f32 %v679_v16, %v893_v29  ;;  %v408_v25 = vmax.f32 %v372_v18, 0.0 }
 0x11d   :  { %v406_v19 = vmax.f32 %v364_v15, 0.0  ;;  %v436_v20 = vadd.f32 %v435_v14, %v405_v13  ;;  %v367_v21 = vadd.f32 %v893_v29, %v366_v17  ;;  %v466_v29 = vld [vmem:[%s950_s5] sm:$0x1] }
 0x11e   :  { %v409_v27 = vmax.f32 %v375_v23, 0.0 }
 0x11f   :  { %v437_v22 = vadd.f32 %v436_v20, %v406_v19  ;;  %v407_v24 = vmax.f32 %v367_v21, 0.0 }
 0x121   :  { %v438_v26 = vadd.f32 %v437_v22, %v407_v24 }
 0x123   :  { %v439_v28 = vadd.f32 %v438_v26, %v408_v25 }
 0x125   :  { %v440_v30 = vadd.f32 %v439_v28, %v409_v27 }
 0x127   :  { %v441_v31 = vrot.slane %v440_v30, 4 }
 0x129   :  { %v442_v32 = vadd.f32 %v441_v31, %v440_v30 }
 0x12b   :  { %v443_v33 = vrot.slane %v442_v32, 2 }
 0x12d   :  { %v444_v34 = vadd.f32 %v443_v33, %v442_v32 }
 0x12f   :  { %v445_v35 = vrot.slane %v444_v34, 1 }
 0x131   :  { %v446_v37 = vadd.f32 %v445_v35, %v444_v34 }
 0x133   :  { %v448_v38 = vadd.f32 %v447_v36, %v446_v37 }
 0x135   :  { %v449_v39 = vpack.c.bf16 %v448_v38, %v448_v38 }
 0x137   :  { %697 = vmatmul.mubr.bf16.vlgmr.msra.gmra.mrb[0].mxu1 %v449_v39 }
 0x20a   :  { %v549_v40 = vpop.f32.mrb[0].mxu1 }
 0x20b   :  { %v550_v41 = vadd.f32 %v549_v40, %v466_v29  ;;  %v698_v42 = vpop.f32.mrb[1].mxu1 }
 0x20c   :  { %v552_v43 = vpop.f32.mrb[2].mxu1 }
 0x20d   :  { %555 = vst [vmem:[#allocation2] sm:$0x1] %v550_v41  ;;  %v699_v44 = vpop.f32.mrb[3].mxu1 }
 0x20e   :  { %742 = shalt.err (!%p739_p4)
}
 0x20f   :  { %s743_s5 = scalar_lea.hbm %s951_s6, 16 }
 0x210   :  { %p744_p5 = scmp.ne.s32.totalorder %s951_s6, %s743_s5  ;;  %p747_p6 = scmp.lt.u32.totalorder %s743_s5, %s951_s6 }
 0x212   :  { %p749_p7 = pnand %p747_p6, %p744_p5 }
 0x214   :  { %752 = shalt.err (!%p749_p7)
}
 0x215   :  { %565 = dma.vmem_to_hbm [thread:$0]  %s563_s29, 16, %s951_s6, [#allocation3]  }
 0x216   :  { %753 = dma.done.wait [#allocation3], 16  }
 0x217   :  { %754 = vsyncadd [#allocation3], 4294967280 }
 0x218   :  { %569 = vsyncpa [#allocation3], 1 }

</bundles_post_ra>
